<compile_context>
chip_gen: v6e
topology: v6e:2x2x1
jax: 0.10.0
libtpu: 0.0.40
codegen_flags: <defaults>
</compile_context>

<pallas_src>
import math
from functools import partial

import jax
import jax.numpy as jnp
from jax.experimental import pallas as pl
from jax.experimental.pallas import tpu as pltpu

# Below this rank, build W with VPU broadcast multiplies; at/above it, use MXU.
_RANK_MXU_THRESHOLD = 8


def _round_up(x, m):
    return ((x + m - 1) // m) * m


def outer_linear_kernel(x_ref, w1_ref, w2_ref, b_ref, o_ref, w_ref):
    # Rebuild the cached W slab only at the first batch tile of this out tile
    # (batch axis is the innermost grid axis).
    @pl.when(pl.program_id(1) == 0)
    def _build_w():
        w1 = w1_ref[...].astype(jnp.float32)      # (in, rank)
        w2 = w2_ref[...].astype(jnp.float32)      # (rank, tn)
        rank = w1.shape[1]
        if rank < _RANK_MXU_THRESHOLD:
            # Low-rank outer product on the VPU: (in,1)*(1,tn) broadcasts,
            # summed over rank with a static Python loop.
            prod = w1[:, 0:1] * w2[0:1, :]
            for r in range(1, rank):
                prod = prod + w1[:, r:r + 1] * w2[r:r + 1, :]
        else:
            prod = jnp.dot(w1, w2, preferred_element_type=jnp.float32)
        # cos argument and cos itself stay f32; only the post-cos result is
        # stored in the slab dtype (f32, or bf16 when bf16_matmul=True).
        w_ref[...] = jnp.cos(80.0 * prod).astype(w_ref.dtype)

    x = x_ref[...]
    w = w_ref[...]
    if w.dtype == jnp.bfloat16 and x.dtype != jnp.bfloat16:
        x = x.astype(jnp.bfloat16)
    # Main matmul on the MXU, f32 accumulation; single bias add per out tile
    # (no K grid axis, so there is no separate accumulator to fold it into).
    y = jnp.dot(x, w, preferred_element_type=jnp.float32)
    o_ref[...] = (y + b_ref[...].astype(jnp.float32)).astype(o_ref.dtype)


@partial(jax.jit, static_argnames=("bf16_matmul",))
def outer_linear(x, w1, w2, b=None, *, bf16_matmul=False):
    batch, in_features = x.shape
    rank, out_features = w2.shape
    assert w1.shape == (in_features, rank)

    if b is None:
        b = jnp.zeros((out_features,), dtype=jnp.float32)

    slab_dtype = jnp.bfloat16 if bf16_matmul else jnp.float32
    slab_bytes = 2 if bf16_matmul else 4
    x_bytes = x.dtype.itemsize

    # ---- tile sizes (budget the W slab at <= 8 MiB so it also fits v7x) ----
    tm = min(256, _round_up(batch, 8))
    tn_cap = _round_up(out_features, 128)
    tn = 128
    for cand in (512, 256):
        if cand <= tn_cap and in_features * cand * slab_bytes <= (8 << 20):
            tn = cand
            break

    # Zero-pad W2 / bias along out to a multiple of tn: interior & final W2 /
    # bias tile reads stay in-bounds and lane-dense.  The OUTPUT is NOT padded
    # (no post-call slice); the final partial tile is a masked store.
    out_pad = _round_up(out_features, tn)
    pad = out_pad - out_features
    if pad:
        w2 = jnp.pad(w2, ((0, 0), (0, pad)))
        b = jnp.pad(b, (0, pad))
    b2d = b.reshape(1, out_pad).astype(jnp.float32)

    n_j = pl.cdiv(out_features, tn)   # out tiles  (parallel)
    n_i = pl.cdiv(batch, tm)          # batch tiles (arbitrary, innermost)

    # ---- VMEM budget & explicit limit ----
    needed = (in_features * tn * slab_bytes          # cached W slab (scratch)
              + 2 * tm * in_features * x_bytes       # double-buffered x tile
              + 2 * in_features * rank * 4           # W1
              + 2 * rank * tn * 4                    # W2 tile
              + 2 * tn * 4                           # bias tile
              + 2 * tm * tn * x_bytes)               # output tile
    vmem_limit = min(max(int(needed * 1.5) + (4 << 20), 16 << 20), 48 << 20)

    cost = pl.CostEstimate(
        flops=2 * batch * in_features * out_features,
        transcendentals=in_features * out_pad,
        bytes_accessed=(n_j * batch * in_features * x_bytes
                        + in_features * rank * 4
                        + rank * out_pad * 4
                        + out_pad * 4
                        + batch * out_features * x_bytes),
    )

    grid_spec = pltpu.PrefetchScalarGridSpec(
        num_scalar_prefetch=0,
        grid=(n_j, n_i),
        in_specs=[
            pl.BlockSpec((tm, in_features), lambda j, i: (i, 0)),    # x
            pl.BlockSpec((in_features, rank), lambda j, i: (0, 0)),  # W1 (whole)
            pl.BlockSpec((rank, tn), lambda j, i: (0, j)),           # W2 tile
            pl.BlockSpec((1, tn), lambda j, i: (0, j)),              # bias tile
        ],
        out_specs=pl.BlockSpec((tm, tn), lambda j, i: (i, j)),
        scratch_shapes=[pltpu.VMEM((in_features, tn), slab_dtype)],
    )

    return pl.pallas_call(
        outer_linear_kernel,
        out_shape=jax.ShapeDtypeStruct((batch, out_features), x.dtype),
        grid_spec=grid_spec,
        compiler_params=pltpu.CompilerParams(
            dimension_semantics=("parallel", "arbitrary"),
            vmem_limit_bytes=vmem_limit),
        cost_estimate=cost,
    )(x, w1, w2, b2d)


if __name__ == "__main__":
    half_pi = math.pi / 2.0

    def reference(x, w1, w2, b):
        w = jnp.cos(80.0 * jnp.dot(w1, w2, precision=jax.lax.Precision.HIGHEST))
        return jnp.dot(x, w, precision=jax.lax.Precision.HIGHEST) + b

    # Case 1: rank-1 (module default), f32 matmul, tight tolerance.
    k = jax.random.split(jax.random.PRNGKey(0), 4)
    x1 = jax.random.normal(k[0], (8, 32), dtype=jnp.float32)
    W1a = jax.random.uniform(k[1], (32, 1), jnp.float32, -half_pi, half_pi)
    W2a = jax.random.uniform(k[2], (1, 32), jnp.float32, -half_pi, half_pi)
    ba = jax.random.normal(k[3], (32,), dtype=jnp.float32)

    out1 = jax.block_until_ready(outer_linear(x1, W1a, W2a, ba))
    ref1 = reference(x1, W1a, W2a, ba)
    assert out1.shape == (8, 32)
    # cos(80*.) amplifies tiny argument differences; 2e-3 leaves margin for
    # EUP-vs-XLA cos range reduction while still catching real bugs.
    assert jnp.allclose(out1, ref1, atol=2e-3, rtol=2e-3), "rank-1 f32 mismatch"

    # Case 2: rank-4, out_features not a multiple of 128 (masked final tile,
    # no post-call slice), bf16 post-cos matmul, looser tolerance.
    k = jax.random.split(jax.random.PRNGKey(1), 4)
    x2 = jax.random.normal(k[0], (16, 64), dtype=jnp.float32)
    W1b = jax.random.uniform(k[1], (64, 4), jnp.float32, -half_pi, half_pi)
    W2b = jax.random.uniform(k[2], (4, 160), jnp.float32, -half_pi, half_pi)
    bb = jax.random.normal(k[3], (160,), dtype=jnp.float32)

    out2 = jax.block_until_ready(outer_linear(x2, W1b, W2b, bb, bf16_matmul=True))
    ref2 = reference(x2, W1b, W2b, bb)
    assert out2.shape == (16, 160)
    assert jnp.allclose(out2, ref2, atol=1e-1, rtol=2e-2), "rank-4 bf16 mismatch"

    print("KERNEL_OK")
</pallas_src>

<mosaic_0001>
module attributes {stable_mosaic.version = 11 : i64} {
  func.func @outer_linear_kernel(%arg0: i32, %arg1: i32, %arg2: memref<8x32xf32, #tpu.memory_space<vmem>>, %arg3: memref<32x1xf32, #tpu.memory_space<vmem>>, %arg4: memref<1x128xf32, #tpu.memory_space<vmem>>, %arg5: memref<1x128xf32, #tpu.memory_space<vmem>>, %arg6: memref<8x128xf32, #tpu.memory_space<vmem>>, %arg7: memref<32x128xf32, #tpu.memory_space<vmem>>) attributes {dimension_semantics = [#tpu.dimension_semantics<parallel>, #tpu.dimension_semantics<arbitrary>], iteration_bounds = array<i64: 1, 1>, scalar_prefetch = 0 : i64, scratch_operands = 1 : i64, tpu.core_type = #tpu.core_type<tc>, window_params = [{transform_indices = @transform_0, window_bounds = array<i64: 8, 32>}, {pipeline_mode = #tpu.pipeline_mode<synchronous>, transform_indices = @transform_1, window_bounds = array<i64: 32, 1>}, {transform_indices = @transform_2, window_bounds = array<i64: 1, 128>}, {transform_indices = @transform_3, window_bounds = array<i64: 1, 128>}, {transform_indices = @transform_4, window_bounds = array<i64: 8, 128>}]} {
    %c0_i32 = arith.constant 0 : i32
    %0 = arith.cmpi eq, %arg1, %c0_i32 : i32
    %1 = arith.extui %0 : i1 to i32
    %c0_i32_0 = arith.constant 0 : i32
    %2 = arith.cmpi ne, %1, %c0_i32_0 : i32
    scf.if %2 {
      %c0_8 = arith.constant 0 : index
      %c0_9 = arith.constant 0 : index
      %10 = vector.load %arg3[%c0_8, %c0_9] : memref<32x1xf32, #tpu.memory_space<vmem>>, vector<32x1xf32>
      %c0_10 = arith.constant 0 : index
      %c0_11 = arith.constant 0 : index
      %11 = vector.load %arg4[%c0_10, %c0_11] : memref<1x128xf32, #tpu.memory_space<vmem>>, vector<1x128xf32>
      %12 = vector.broadcast %10 : vector<32x1xf32> to vector<32x128xf32>
      %13 = vector.broadcast %11 : vector<1x128xf32> to vector<32x128xf32>
      %14 = arith.mulf %12, %13 : vector<32x128xf32>
      %cst_12 = arith.constant 8.000000e+01 : f32
      %15 = vector.broadcast %cst_12 : f32 to vector<32x128xf32>
      %16 = arith.mulf %15, %14 : vector<32x128xf32>
      %17 = math.cos %16 : vector<32x128xf32>
      %c0_13 = arith.constant 0 : index
      %c0_14 = arith.constant 0 : index
      %18 = vector.load %arg7[%c0_13, %c0_14] : memref<32x128xf32, #tpu.memory_space<vmem>>, vector<32x128xf32>
      tpu.vector_store %arg7[%c0_13, %c0_14], %17 {strides = array<i32>} : memref<32x128xf32, #tpu.memory_space<vmem>>, vector<32x128xf32>,
    } else {
    }
    %c0 = arith.constant 0 : index
    %c0_1 = arith.constant 0 : index
    %3 = vector.load %arg2[%c0, %c0_1] : memref<8x32xf32, #tpu.memory_space<vmem>>, vector<8x32xf32>
    %c0_2 = arith.constant 0 : index
    %c0_3 = arith.constant 0 : index
    %4 = vector.load %arg7[%c0_2, %c0_3] : memref<32x128xf32, #tpu.memory_space<vmem>>, vector<32x128xf32>
    %cst = arith.constant dense<0.000000e+00> : vector<8x128xf32>
    %5 = tpu.matmul %3, %4, %cst {dimension_numbers = #tpu.dot_dimension_numbers<[1], [0], [0], [1], [0, 0, 1, 1], [], []>} : vector<8x32xf32>, vector<32x128xf32>, vector<8x128xf32> -> vector<8x128xf32>
    %c0_4 = arith.constant 0 : index
    %c0_5 = arith.constant 0 : index
    %6 = vector.load %arg5[%c0_4, %c0_5] : memref<1x128xf32, #tpu.memory_space<vmem>>, vector<1x128xf32>
    %7 = vector.broadcast %6 : vector<1x128xf32> to vector<8x128xf32>
    %8 = arith.addf %5, %7 : vector<8x128xf32>
    %c0_6 = arith.constant 0 : index
    %c0_7 = arith.constant 0 : index
    %9 = vector.load %arg6[%c0_6, %c0_7] : memref<8x128xf32, #tpu.memory_space<vmem>>, vector<8x128xf32>
    tpu.vector_store %arg6[%c0_6, %c0_7], %8 {strides = array<i32>} : memref<8x128xf32, #tpu.memory_space<vmem>>, vector<8x128xf32>,
    return
  }
  func.func @transform_0(%arg0: i32, %arg1: i32) -> (i32, i32) {
    %c0_i32 = arith.constant 0 : i32
    %c0_i32_0 = arith.constant 0 : i32
    return %arg1, %c0_i32 : i32, i32
  }
  func.func @transform_1(%arg0: i32, %arg1: i32) -> (i32, i32) {
    %c0_i32 = arith.constant 0 : i32
    %c0_i32_0 = arith.constant 0 : i32
    %c0_i32_1 = arith.constant 0 : i32
    return %c0_i32, %c0_i32_0 : i32, i32
  }
  func.func @transform_2(%arg0: i32, %arg1: i32) -> (i32, i32) {
    %c0_i32 = arith.constant 0 : i32
    %c0_i32_0 = arith.constant 0 : i32
    return %c0_i32, %arg0 : i32, i32
  }
  func.func @transform_3(%arg0: i32, %arg1: i32) -> (i32, i32) {
    %c0_i32 = arith.constant 0 : i32
    %c0_i32_0 = arith.constant 0 : i32
    return %c0_i32, %arg0 : i32, i32
  }
  func.func @transform_4(%arg0: i32, %arg1: i32) -> (i32, i32) {
    %c0_i32 = arith.constant 0 : i32
    return %arg1, %arg0 : i32, i32
  }
}

</mosaic_0001>

<bundles_post_ra>
// kernel: outer_linear.1
= control target key start
LH: loop header
LB: loop body
LE: loop exit
PB: predicated region body
PF: predicated region fallthrough
CT: control target
= control target key end

     0   :  { %v679_v2 = vmov 0   ;;  %s1123_s0 = inlined_call_operand.vmem [shape: f32[8,32], index: 0, kind: input, shape index: {}]   ;;  %s1124_s1 = inlined_call_operand.vmem [shape: f32[32,1], index: 1, kind: input, shape index: {}]   ;;  %s1125_s2 = inlined_call_operand.vmem [shape: f32[1,128], index: 2, kind: input, shape index: {}]   ;;  %s1126_s3 = inlined_call_operand.vmem [shape: f32[1,128], index: 3, kind: input, shape index: {}]   ;;  %s1127_s4 = inlined_call_operand.hbm [shape: f32[8,32], index: 4, kind: output, shape index: {}]  }
   0x1   :  { %v25_v0 = vld [vmem:[%s1124_s1 + $0x18] sm:$0xff]  ;;  %v23_v1 = vld [vmem:[%s1124_s1 + $0x8] sm:$0xff]  ;;  %640 = vset.pattern.permute.xlu1 %v679_v2  ;;  %639 = vset.pattern.permute.xlu0 %v679_v2 }
   0x2   :  { %44 = vperm.xlu0 %639, %v25_v0   ;;  %34 = vperm.xlu1 %640, %v23_v1  }
   0x3   :  { %9 = vsyncpa [#allocation4], 0  ;;  %v24_v3 = vld [vmem:[%s1124_s1 + $0x10] sm:$0xff]  ;;  %v22_v4 = vld [vmem:[%s1124_s1] sm:$0xff]  ;;  %v680_v5 = vmov 0.0   ;;  %s688_s27 = smov [#allocation3]  }
   0x4   :  { %602 = vmatprep.subr.mxu0 %v680_v5  ;;  %v578_v6 = vld [vmem:[%s1125_s2] ss:$0 sm:$0xff]  ;;  %v681_v45 = vmov 920167782   ;;  %v682_v53 = vmov 2102212464  }
   0x5   :  { %v683_v55 = vmov 1326507024   ;;  %s570_s28 = sshll.u32 %s688_s27, 4  ;;  %s571_s28 = int_to_ptr.vmem [resolvable:$true] %s570_s28 }
   0x6   :  { %39 = vperm.xlu0 %639, %v24_v3   ;;  %29 = vperm.xlu1 %640, %v22_v4   ;;  %s657_s29 = scalar_lea.vmem %s571_s28, 128  ;;  %p662_p1 = scmp.lt.s32.totalorder %s571_s28, %s571_s28 }
   0x7   :  { %p658_p0 = scmp.ne.s32.totalorder %s571_s28, %s657_s29  ;;  %p663_p2 = scmp.lt.s32.totalorder %s657_s29, %s657_s29 }
   0x9   :  { %p664_p3 = por %p663_p2, %p662_p1 }
   0xb   :  { %p665_p4 = pnand %p664_p3, %p658_p0 }
  0x7d   :  { %v45_v7 = vpop.permute.xlu0 %44  ;;  %v35_v8 = vpop.permute.xlu1 %34 }
  0x7e   :  { %v56_v9 = vmul.f32 %v578_v6, %v45_v7  ;;  %v54_v10 = vmul.f32 %v578_v6, %v35_v8 }
  0x80   :  { %v730_v11 = vmul.f32 80.0, %v56_v9  ;;  %v732_v12 = vmul.f32 80.0, %v54_v10 }
  0x81   :  { %v40_v13 = vpop.permute.xlu0 %39  ;;  %v30_v14 = vpop.permute.xlu1 %29 }
  0x82   :  { %v373_v15 = vand.u32 2139095040, %v730_v11  ;;  %v167_v16 = vand.u32 2139095040, %v732_v12  ;;  %v55_v17 = vmul.f32 %v578_v6, %v40_v13  ;;  %v53_v18 = vmul.f32 %v578_v6, %v30_v14 }
  0x83   :  { %v370_v31 = vand.u32 2147483647, %v730_v11  ;;  %v164_v39 = vand.u32 2147483647, %v732_v12 }
  0x84   :  { %v374_v19 = vshrl.u32 %v373_v15, 23  ;;  %v168_v20 = vshrl.u32 %v167_v16, 23  ;;  %v736_v21 = vmul.f32 80.0, %v55_v17  ;;  %v738_v22 = vmul.f32 80.0, %v53_v18 }
  0x85   :  { %v377_v41 = vand.u32 8388607, %v370_v31  ;;  %v757_v51 = vand.u32 8388607, %v164_v39  ;;  %v684_v18 = vmov 683565275  }
  0x86   :  { %v591_v23 = vadd.s32 4294967169, %v374_v19  ;;  %v583_v24 = vadd.s32 4294967169, %v168_v20  ;;  %v270_v25 = vand.u32 2139095040, %v736_v21  ;;  %v64_v26 = vand.u32 2139095040, %v738_v22 }
  0x87   :  { %v267_v32 = vand.u32 2147483647, %v736_v21  ;;  %v378_v49 = vor.u32 8388608, %v377_v41  ;;  %v172_v13 = vor.u32 8388608, %v757_v51  ;;  %v685_v20 = vmov 2475754826  }
  0x88   :  { %v380_v27 = vadd.s32 1, %v591_v23  ;;  %v174_v28 = vadd.s32 1, %v583_v24  ;;  %v271_v29 = vshrl.u32 %v270_v25, 23  ;;  %v65_v30 = vshrl.u32 %v64_v26, 23 }
  0x89   :  { %v274_v42 = vand.u32 8388607, %v267_v32  ;;  %v781_v2 = vshll.u32 %v378_v49, 8  ;;  %v686_v25 = vmov 2131351028  }
  0x8a   :  { %vm381_vm0 = vcmp.gt.s32.totalorder %v380_v27, 0  ;;  %vm175_vm1 = vcmp.gt.s32.totalorder %v174_v28, 0  ;;  %v587_v33 = vadd.s32 4294967169, %v271_v29  ;;  %v579_v38 = vadd.s32 4294967169, %v65_v30 }
  0x8b   :  { %v382_v34 = vsel %vm381_vm0, %v380_v27, 0  ;;  %v176_v35 = vsel %vm175_vm1, %v174_v28, 0  ;;  %v275_v50 = vor.u32 8388608, %v274_v42 }
  0x8c   :  { %v384_v36 = vand.u32 31, %v382_v34  ;;  %v744_v37 = vand.u32 31, %v176_v35  ;;  %v277_v40 = vadd.s32 1, %v587_v33  ;;  %v71_v47 = vadd.s32 1, %v579_v38 }
  0x8d   :  { %v759_v52 = vshrl.u32 %v382_v34, 5  ;;  %v779_v1 = vshrl.u32 %v176_v35, 5  ;;  %v783_v3 = vshll.u32 %v275_v50, 8 }
  0x8e   :  { %v385_v43 = vsub.s32 32, %v384_v36  ;;  %v752_v44 = vsub.s32 32, %v744_v37  ;;  %vm278_vm2 = vcmp.gt.s32.totalorder %v277_v40, 0  ;;  %v396_v54 = vshll.u32 %v682_v53, %v384_v36 }
  0x8f   :  { %v279_v48 = vsel %vm278_vm2, %v277_v40, 0  ;;  %v399_v58 = vshll.u32 %v681_v45, %v384_v36  ;;  %v190_v59 = vshll.u32 %v682_v53, %v744_v37  ;;  %v772_v61 = vshll.u32 %v681_v45, %v744_v37 }
  0x90   :  { %v397_v46 = vshrl.u32 %v681_v45, %v385_v43  ;;  %v400_v56 = vshrl.u32 %v683_v55, %v385_v43  ;;  %v763_v57 = vand.u32 31, %v279_v48  ;;  %v191_v60 = vshrl.u32 %v681_v45, %v752_v44 }
  0x91   :  { %v776_v63 = vshrl.u32 %v683_v55, %v752_v44  ;;  %vm72_vm3 = vcmp.gt.s32.totalorder %v71_v47, 0  ;;  %v785_v6 = vshrl.u32 %v279_v48, 5  ;;  %vm405_vm4 = vcmp.lt.s32.totalorder %v759_v52, 4 }
  0x92   :  { %v398_v62 = vor.u32 %v397_v46, %v396_v54  ;;  %v282_v0 = vsub.s32 32, %v763_v57  ;;  %v401_v4 = vor.u32 %v400_v56, %v399_v58  ;;  %v293_v7 = vshll.u32 %v682_v53, %v763_v57 }
  0x93   :  { %v791_v9 = vor.u32 %v191_v60, %v190_v59  ;;  %v793_v10 = vsel %vm72_vm3, %v71_v47, 0  ;;  %v195_v15 = vor.u32 %v776_v63, %v772_v61  ;;  %v387_v19 = vshll.u32 %v684_v18, %v384_v36 }
  0x94   :  { %v294_v8 = vshrl.u32 %v681_v45, %v282_v0  ;;  %v411_v14 = vsel %vm405_vm4, %v398_v62, 920167782  ;;  %v297_v17 = vshrl.u32 %v683_v55, %v282_v0  ;;  %v388_v23 = vshrl.u32 %v685_v20, %v385_v43 }
  0x95   :  { %v390_v24 = vshll.u32 %v685_v20, %v384_v36  ;;  %v391_v26 = vshrl.u32 %v686_v25, %v385_v43  ;;  %v415_v27 = vsel %vm405_vm4, %v401_v4, 1326507024  ;;  %v296_v28 = vshll.u32 %v681_v45, %v763_v57 }
  0x96   :  { %v295_v16 = vor.u32 %v294_v8, %v293_v7  ;;  %vm302_vm5 = vcmp.lt.s32.totalorder %v785_v6, 4  ;;  %v386_v29 = vshrl.u32 %v684_v18, %v385_v43  ;;  %v389_v30 = vor.u32 %v388_v23, %v387_v19 }
  0x97   :  { %v392_v33 = vor.u32 %v391_v26, %v390_v24  ;;  %v393_v34 = vshll.u32 %v686_v25, %v384_v36  ;;  %v394_v35 = vshrl.u32 %v682_v53, %v385_v43  ;;  %v298_v38 = vor.u32 %v297_v17, %v296_v28 }
  0x98   :  { %v308_v40 = vsel %vm302_vm5, %v295_v16, 920167782  ;;  %vm402_vm6 = vcmp.lt.s32.totalorder %v759_v52, 1  ;;  %vm404_vm7 = vcmp.lt.s32.totalorder %v759_v52, 3  ;;  %vm403_vm8 = vcmp.lt.s32.totalorder %v759_v52, 2 }
  0x99   :  { %v395_v41 = vor.u32 %v394_v35, %v393_v34  ;;  %v410_v42 = vsel %vm402_vm6, %v389_v30, %v392_v33  ;;  %v416_v46 = vsel %vm404_vm7, %v398_v62, %v415_v27  ;;  %v406_v47 = vsel %vm402_vm6, %v386_v29, %v389_v30 }
  0x9a   :  { %v284_v48 = vshll.u32 %v684_v18, %v763_v57  ;;  %v285_v36 = vshrl.u32 %v685_v20, %v282_v0  ;;  %v287_v43 = vshll.u32 %v685_v20, %v763_v57  ;;  %v288_v56 = vshrl.u32 %v686_v25, %v282_v0 }
  0x9b   :  { %v407_v49 = vsel %vm405_vm4, %v395_v41, 2102212464  ;;  %v412_v50 = vsel %vm404_vm7, %v395_v41, %v411_v14  ;;  %v414_v54 = vsel %vm402_vm6, %v392_v33, %v395_v41  ;;  %v312_v19 = vsel %vm302_vm5, %v298_v38, 1326507024 }
  0x9c   :  { %v408_v58 = vsel %vm404_vm7, %v392_v33, %v407_v49  ;;  %v413_v59 = vsel %vm403_vm8, %v410_v42, %v412_v50  ;;  %v417_v60 = vsel %vm403_vm8, %v414_v54, %v416_v46  ;;  %v286_v62 = vor.u32 %v285_v36, %v284_v48 }
  0x9d   :  { %v409_v4 = vsel %vm403_vm8, %v406_v47, %v408_v58  ;;  %v827_v7 = vmul.u32.u64.low %v781_v2, %v417_v60  ;;  %v828_v8 = vmul.u32.u64.high %v781_v2, %v417_v60, %v827_v7  ;;  %v289_v17 = vor.u32 %v288_v56, %v287_v43 }
  0x9e   :  { %v833_v52 = vmul.u32.u64.low %v781_v2, %v413_v59  ;;  %v834_v23 = vmul.u32.u64.high %v781_v2, %v413_v59, %v833_v52  ;;  %v283_v14 = vshrl.u32 %v684_v18, %v282_v0  ;;  %v425_v24 = vmul.u32 %v781_v2, %v409_v4 }
  0x9f   :  { %v290_v26 = vshll.u32 %v686_v25, %v763_v57  ;;  %v291_v27 = vshrl.u32 %v682_v53, %v282_v0  ;;  %vm299_vm9 = vcmp.lt.s32.totalorder %v785_v6, 1  ;;  %vm300_vm10 = vcmp.lt.s32.totalorder %v785_v6, 2 }
  0xa0   :  { %vm301_vm11 = vcmp.lt.s32.totalorder %v785_v6, 3  ;;  %v303_v28 = vsel %vm299_vm9, %v283_v14, %v286_v62  ;;  %v307_v29 = vsel %vm299_vm9, %v286_v62, %v289_v17  ;;  %vm427_vm12 = vc.u32 %v828_v8, %v833_v52 }
  0xa1   :  { %v292_v2 = vor.u32 %v291_v27, %v290_v26  ;;  %v313_v57 = vsel %vm301_vm11, %v295_v16, %v312_v19  ;;  %v181_v0 = vshll.u32 %v684_v18, %v744_v37  ;;  %v428_v30 = vadd.s32 1, %v834_v23 }
  0xa2   :  { %v182_v33 = vshrl.u32 %v685_v20, %v752_v44  ;;  %v184_v34 = vshll.u32 %v685_v20, %v744_v37  ;;  %v185_v35 = vshrl.u32 %v686_v25, %v752_v44  ;;  %v187_v42 = vshll.u32 %v686_v25, %v744_v37 }
  0xa3   :  { %v304_v38 = vsel %vm302_vm5, %v292_v2, 2102212464  ;;  %v309_v16 = vsel %vm301_vm11, %v292_v2, %v308_v40  ;;  %v311_v41 = vsel %vm299_vm9, %v289_v17, %v292_v2  ;;  %v429_v46 = vsel %vm427_vm12, %v428_v30, %v834_v23 }
  0xa4   :  { %v305_v47 = vsel %vm301_vm11, %v289_v17, %v304_v38  ;;  %v310_v48 = vsel %vm300_vm10, %v307_v29, %v309_v16  ;;  %v314_v36 = vsel %vm300_vm10, %v311_v41, %v313_v57  ;;  %v430_v43 = vadd.s32 %v429_v46, %v425_v24 }
  0xa5   :  { %v306_v40 = vsel %vm300_vm10, %v303_v28, %v305_v47  ;;  %v880_v49 = vmul.u32.u64.low %v783_v3, %v314_v36  ;;  %v881_v50 = vmul.u32.u64.high %v783_v3, %v314_v36, %v880_v49  ;;  %vm199_vm13 = vcmp.lt.s32.totalorder %v779_v1, 4 }
  0xa6   :  { %v885_v37 = vmul.u32.u64.low %v783_v3, %v310_v48  ;;  %v886_v54 = vmul.u32.u64.high %v783_v3, %v310_v48, %v885_v37  ;;  %v183_v56 = vor.u32 %v182_v33, %v181_v0  ;;  %v890_v58 = vand.u32 31, %v793_v10 }
  0xa7   :  { %v431_v59 = vadd.s32 536870912, %v430_v43  ;;  %v186_v60 = vor.u32 %v185_v35, %v184_v34  ;;  %v188_v6 = vshrl.u32 %v682_v53, %v752_v44  ;;  %v205_v62 = vsel %vm199_vm13, %v791_v9, 920167782 }
  0xa8   :  { %v209_v4 = vsel %vm199_vm13, %v195_v15, 1326507024  ;;  %v322_v7 = vmul.u32 %v783_v3, %v306_v40  ;;  %v180_v17 = vshrl.u32 %v684_v18, %v752_v44  ;;  %vm324_vm14 = vc.u32 %v881_v50, %v885_v37 }
  0xa9   :  { %v905_v19 = vshrl.u32 %v431_v59, 30  ;;  %v189_v23 = vor.u32 %v188_v6, %v187_v42  ;;  %vm196_vm15 = vcmp.lt.s32.totalorder %v779_v1, 1  ;;  %v325_v14 = vadd.s32 1, %v886_v54 }
  0xaa   :  { %vm197_vm0 = vcmp.lt.s32.totalorder %v779_v1, 2  ;;  %vm198_vm1 = vcmp.lt.s32.totalorder %v779_v1, 3  ;;  %v204_v61 = vsel %vm196_vm15, %v183_v56, %v186_v60  ;;  %v212_v28 = vshll.u32 %v172_v13, 8 }
  0xab   :  { %v433_v63 = vshll.u32 %v905_v19, 30  ;;  %v201_v44 = vsel %vm199_vm13, %v189_v23, 2102212464  ;;  %v206_v3 = vsel %vm198_vm1, %v189_v23, %v205_v62  ;;  %v210_v15 = vsel %vm198_vm1, %v791_v9, %v209_v4 }
  0xac   :  { %v326_v24 = vsel %vm324_vm14, %v325_v14, %v886_v54  ;;  %v207_v26 = vsel %vm197_vm0, %v204_v61, %v206_v3  ;;  %v208_v27 = vsel %vm196_vm15, %v186_v60, %v189_v23  ;;  %v927_v29 = vsub.s32 32, %v890_v58 }
  0xad   :  { %v434_v2 = vsub.s32 %v430_v43, %v433_v63  ;;  %v327_v57 = vadd.s32 %v326_v24, %v322_v7  ;;  %v200_v0 = vsel %vm196_vm15, %v180_v17, %v183_v56  ;;  %v202_v9 = vsel %vm198_vm1, %v186_v60, %v201_v44 }
  0xae   :  { %v211_v30 = vsel %vm197_vm0, %v208_v27, %v210_v15  ;;  %v933_v33 = vmul.u32.u64.low %v212_v28, %v207_v26  ;;  %v934_v34 = vmul.u32.u64.high %v212_v28, %v207_v26, %v933_v33  ;;  %v88_v16 = vshrl.u32 %v681_v45, %v927_v29 }
  0xaf   :  { %v436_v35 = vsub.s32 0, %v434_v2  ;;  %v328_v38 = vadd.s32 536870912, %v327_v57  ;;  %v937_v51 = vmul.u32.u64.low %v212_v28, %v211_v30  ;;  %v938_v13 = vmul.u32.u64.high %v212_v28, %v211_v30, %v937_v51 }
  0xb0   :  { %v203_v42 = vsel %vm197_vm0, %v200_v0, %v202_v9  ;;  %v91_v46 = vshrl.u32 %v683_v55, %v927_v29  ;;  %v222_v48 = vadd.s32 1, %v934_v34  ;;  %v950_v36 = vshrl.u32 %v793_v10, 5 }
  0xb1   :  { %v592_v41 = vmin.u32 %v436_v35, %v434_v2  ;;  %v946_v47 = vshrl.u32 %v328_v38, 30  ;;  %v87_v43 = vshll.u32 %v682_v53, %v890_v58  ;;  %v90_v49 = vshll.u32 %v681_v45, %v890_v58 }
  0xb2   :  { %v219_v54 = vmul.u32 %v212_v28, %v203_v42  ;;  %vm221_vm2 = vc.u32 %v938_v13, %v933_v33  ;;  %vm96_vm3 = vcmp.lt.s32.totalorder %v950_v36, 4  ;;  %v61_v7 = vand.u32 2147483647, %v738_v22 }
  0xb3   :  { %v438_v40 = vclz %v592_v41  ;;  %v330_v1 = vshll.u32 %v946_v47, 30  ;;  %v959_v55 = vor.u32 %v88_v16, %v87_v43  ;;  %v223_v59 = vsel %vm221_vm2, %v222_v48, %v934_v34 }
  0xb4   :  { %v92_v10 = vor.u32 %v91_v46, %v90_v49  ;;  %v224_v6 = vadd.s32 %v223_v59, %v219_v54  ;;  %v426_v23 = vadd.s32 %v833_v52, %v828_v8  ;;  %v79_v3 = vshrl.u32 %v685_v20, %v927_v29 }
  0xb5   :  { %v593_v56 = vadd.s32 4294967294, %v438_v40  ;;  %v962_v60 = vsub.s32 %v327_v57, %v330_v1  ;;  %v102_v17 = vsel %vm96_vm3, %v959_v55, 920167782  ;;  %v82_v15 = vshrl.u32 %v686_v25, %v927_v29 }
  0xb6   :  { %v225_v4 = vadd.s32 536870912, %v224_v6  ;;  %v106_v63 = vsel %vm96_vm3, %v92_v10, 1326507024  ;;  %v68_v8 = vand.u32 8388607, %v61_v7  ;;  %v78_v52 = vshll.u32 %v684_v18, %v890_v58 }
  0xb7   :  { %vm594_vm4 = vcmp.lt.s32.totalorder %v593_v56, 0  ;;  %v333_v45 = vsub.s32 0, %v962_v60  ;;  %v85_v0 = vshrl.u32 %v682_v53, %v927_v29  ;;  %vm372_vm5 = vcmp.lt.s32.totalorder %v730_v11, 0 }
  0xb8   :  { %v441_v62 = vsel %vm594_vm4, 0, %v593_v56  ;;  %v979_v28 = vshrl.u32 %v225_v4, 30  ;;  %v456_v35 = vsub.s32 4, %v905_v19  ;;  %v323_v38 = vadd.s32 %v885_v37, %v881_v50 }
  0xb9   :  { %v442_v14 = vsub.s32 32, %v441_v62  ;;  %v446_v61 = vsub.s32 4294967266, %v441_v62  ;;  %v588_v44 = vmin.u32 %v333_v45, %v962_v60  ;;  %v443_v24 = vshll.u32 %v434_v2, %v441_v62 }
  0xba   :  { %v227_v34 = vshll.u32 %v979_v28, 30  ;;  %v81_v2 = vshll.u32 %v685_v20, %v890_v58  ;;  %v84_v16 = vshll.u32 %v686_v25, %v890_v58  ;;  %vm998_vm6 = vcmp.le.f32.partialorder %v370_v31, 0.7853982 }
  0xbb   :  { %v444_v26 = vshrl.u32 %v426_v23, %v442_v14  ;;  %v447_v27 = vadd.s32 127, %v446_v61  ;;  %v335_v57 = vclz %v588_v44  ;;  %v80_v20 = vor.u32 %v79_v3, %v78_v52 }
  0xbc   :  { %v1002_v42 = vsub.s32 %v224_v6, %v227_v34  ;;  %v83_v46 = vor.u32 %v82_v15, %v81_v2  ;;  %v69_v48 = vor.u32 8388608, %v68_v8  ;;  %v77_v50 = vshrl.u32 %v684_v18, %v927_v29 }
  0xbd   :  { %v445_v9 = vor.u32 %v444_v26, %v443_v24  ;;  %v448_v30 = vshll.u32 %v447_v27, 23  ;;  %v589_v51 = vadd.s32 4294967294, %v335_v57  ;;  %v86_v37 = vor.u32 %v85_v0, %v84_v16 }
  0xbe   :  { %v230_v58 = vsub.s32 0, %v1002_v42  ;;  %vm93_vm8 = vcmp.lt.s32.totalorder %v950_v36, 1  ;;  %vm94_vm9 = vcmp.lt.s32.totalorder %v950_v36, 2  ;;  %vm95_vm10 = vcmp.lt.s32.totalorder %v950_v36, 3 }
  0xbf   :  { %v449_v41 = vor.u32 4788187, %v448_v30  ;;  %vm590_vm7 = vcmp.lt.s32.totalorder %v589_v51, 0  ;;  %v452_v40 = vcvt.s32.f32 %v445_v9  ;;  %v101_v18 = vsel %vm93_vm8, %v80_v20, %v83_v46 }
  0xc0   :  { %v338_v25 = vsel %vm590_vm7, 0, %v589_v51  ;;  %v584_v54 = vmin.u32 %v230_v58, %v1002_v42  ;;  %v103_v10 = vsel %vm95_vm10, %v86_v37, %v102_v17  ;;  %v105_v45 = vsel %vm93_vm8, %v83_v46, %v86_v37 }
  0xc1   :  { %v450_v43 = vand.u32 2147483647, %v449_v41  ;;  %v339_v31 = vsub.s32 32, %v338_v25  ;;  %v343_v49 = vsub.s32 4294967266, %v338_v25  ;;  %v340_v29 = vshll.u32 %v962_v60, %v338_v25 }
  0xc2   :  { %v232_v62 = vclz %v584_v54  ;;  %v107_v4 = vsel %vm95_vm10, %v959_v55, %v106_v63  ;;  %v220_v61 = vadd.s32 %v933_v33, %v938_v13  ;;  %v109_v3 = vshll.u32 %v69_v48, 8 }
  0xc3   :  { %v453_v1 = vmul.f32 %v452_v40, %v450_v43  ;;  %v341_v56 = vshrl.u32 %v323_v38, %v339_v31  ;;  %v344_v59 = vadd.s32 127, %v343_v49  ;;  %v108_v60 = vsel %vm94_vm9, %v105_v45, %v107_v4  ;;  %v477_v45 = vld [vmem:[%s1123_s0] sm:$0xff] }
  0xc4   :  { %v585_v44 = vadd.s32 4294967294, %v232_v62  ;;  %v98_v55 = vsel %vm96_vm3, %v86_v37, 2102212464  ;;  %v104_v63 = vsel %vm94_vm9, %v101_v18, %v103_v10  ;;  %vm687_vm11 = vmmov 0  }
  0xc5   :  { %v454_v6 = vxor.u32 2147483648, %v453_v1  ;;  %v342_v23 = vor.u32 %v341_v56, %v340_v29  ;;  %v345_v14 = vshll.u32 %v344_v59, 23  ;;  %610 = vmatprep.mubr.msk.f32.mxu0 %vm687_vm11, %v680_v5  ;;  %v97_v0 = vsel %vm93_vm8, %v77_v50, %v80_v20 }
  0xc6   :  { %vm586_vm12 = vcmp.lt.s32.totalorder %v585_v44, 0  ;;  %v1035_v33 = vmul.u32.u64.low %v109_v3, %v108_v60  ;;  %v1036_v13 = vmul.u32.u64.high %v109_v3, %v108_v60, %v1035_v33  ;;  %v99_v9 = vsel %vm95_vm10, %v83_v46, %v98_v55 }
  0xc7   :  { %v455_v17 = vsel %vm372_vm5, %v454_v6, %v453_v1  ;;  %v346_v24 = vor.u32 4788187, %v345_v14  ;;  %v349_v27 = vcvt.s32.f32 %v342_v23  ;;  %v235_v57 = vsel %vm586_vm12, 0, %v585_v44 }
  0xc8   :  { %v458_v15 = vsel %vm998_vm6, %v730_v11, %v455_v17  ;;  %v236_v8 = vsub.s32 32, %v235_v57  ;;  %v240_v52 = vsub.s32 4294967266, %v235_v57  ;;  %v237_v38 = vshll.u32 %v1002_v42, %v235_v57 }
  0xc9   :  { %641 = vcosq.f32 %v458_v15  ;;  %v347_v26 = vand.u32 2147483647, %v346_v24  ;;  %v1042_v34 = vmul.u32.u64.low %v109_v3, %v104_v63  ;;  %v1043_v2 = vmul.u32.u64.high %v109_v3, %v104_v63, %v1042_v34 }
  0xca   :  { %643 = vsinq.f32 %v458_v15  ;;  %v238_v51 = vshrl.u32 %v220_v61, %v236_v8  ;;  %v241_v16 = vadd.s32 127, %v240_v52  ;;  %v457_v41 = vsel %vm372_vm5, %v456_v35, %v905_v19 }
  0xcb   :  { %v350_v30 = vmul.f32 %v349_v27, %v347_v26  ;;  %v100_v20 = vsel %vm94_vm9, %v97_v0, %v99_v9  ;;  %vm269_vm13 = vcmp.lt.s32.totalorder %v736_v21, 0  ;;  %vm118_vm14 = vc.u32 %v1036_v13, %v1042_v34 }
  0xcc   :  { %v239_v46 = vor.u32 %v238_v51, %v237_v38  ;;  %v242_v50 = vshll.u32 %v241_v16, 23  ;;  %vm1059_vm15 = vcmp.le.f32.partialorder %v267_v32, 0.7853982  ;;  %v119_v35 = vadd.s32 1, %v1043_v2 }
  0xcd   :  { %v351_v48 = vxor.u32 2147483648, %v350_v30  ;;  %v459_v36 = vsel %vm998_vm6, 0, %v457_v41  ;;  %v116_v40 = vmul.u32 %v109_v3, %v100_v20  ;;  %v353_v25 = vsub.s32 4, %v946_v47 }
  0xce   :  { %v243_v43 = vor.u32 4788187, %v242_v50  ;;  %v120_v32 = vsel %vm118_vm14, %v119_v35, %v1043_v2  ;;  %v246_v31 = vcvt.s32.f32 %v239_v46  ;;  %v463_v1 = vand.u32 3, %v459_v36 }
  0xcf   :  { %v352_v19 = vsel %vm269_vm13, %v351_v48, %v350_v30  ;;  %v121_v49 = vadd.s32 %v120_v32, %v116_v40  ;;  %v354_v59 = vsel %vm269_vm13, %v353_v25, %v946_v47  ;;  %vm1080_vm1 = vcmp.le.f32.partialorder %v164_v39, 0.7853982 }
  0xd0   :  { %v355_v37 = vsel %vm1059_vm15, %v736_v21, %v352_v19  ;;  %v244_v58 = vand.u32 2147483647, %v243_v43  ;;  %vm468_vm0 = vcmp.eq.s32.totalorder %v463_v1, 2  ;;  %vm166_vm2 = vcmp.lt.s32.totalorder %v732_v12, 0 }
  0xd1   :  { %645 = vcosq.f32 %v355_v37  ;;  %v122_v18 = vadd.s32 536870912, %v121_v49  ;;  %vm465_vm3 = vcmp.eq.s32.totalorder %v463_v1, 0  ;;  %vm464_vm4 = vcmp.lt.s32.totalorder %v463_v1, 2 }
  0xd2   :  { %647 = vsinq.f32 %v355_v37  ;;  %v247_v54 = vmul.f32 %v246_v31, %v244_v58  ;;  %v356_v61 = vsel %vm1059_vm15, 0, %v354_v59  ;;  %vm462_vm5 = vweird.f32 %v730_v11 }
  0xd3   :  { %v1076_v6 = vshrl.u32 %v122_v18, 30  ;;  %v250_v3 = vsub.s32 4, %v979_v28  ;;  %v360_v15 = vand.u32 3, %v356_v61  ;;  %vm359_vm9 = vweird.f32 %v736_v21 }
  0xd4   :  { %v248_v10 = vxor.u32 2147483648, %v247_v54  ;;  %vm256_vm14 = vweird.f32 %v732_v12  ;;  %vm63_vm15 = vcmp.lt.s32.totalorder %v738_v22, 0 }
  0xd5   :  { %v124_v47 = vshll.u32 %v1076_v6, 30  ;;  %v251_v11 = vsel %vm166_vm2, %v250_v3, %v979_v28  ;;  %vm365_vm6 = vcmp.eq.s32.totalorder %v360_v15, 2  ;;  %vm362_vm7 = vcmp.eq.s32.totalorder %v360_v15, 0 }
  0xd6   :  { %v642_v53 = vpop.eup %641  ;;  %v249_v23 = vsel %vm166_vm2, %v248_v10, %v247_v54  ;;  %vm361_vm8 = vcmp.lt.s32.totalorder %v360_v15, 2  ;;  %v253_v0 = vsel %vm1080_vm1, 0, %v251_v11  ;;  %v117_v28 = vadd.s32 %v1042_v34, %v1036_v13 }
  0xd7   :  { %v644_v29 = vpop.eup %643  ;;  %v469_v56 = vxor.u32 2147483648, %v642_v53  ;;  %v252_v39 = vsel %vm1080_vm1, %v732_v12, %v249_v23  ;;  %v125_v17 = vsub.s32 %v121_v49, %v124_v47  ;;  %v257_v38 = vand.u32 3, %v253_v0 }
  0xd8   :  { %v466_v62 = vxor.u32 2147483648, %v644_v29  ;;  %649 = vcosq.f32 %v252_v39  ;;  %v147_v12 = vsub.s32 4, %v1076_v6 }
  0xd9   :  { %v470_v4 = vsel %vm468_vm0, %v469_v56, %v644_v29  ;;  %651 = vsinq.f32 %v252_v39  ;;  %v127_v24 = vsub.s32 0, %v125_v17  ;;  %vm262_vm11 = vcmp.eq.s32.totalorder %v257_v38, 2 }
  0xda   :  { %v467_v14 = vsel %vm465_vm3, %v642_v53, %v466_v62  ;;  %vm259_vm12 = vcmp.eq.s32.totalorder %v257_v38, 0  ;;  %vm258_vm13 = vcmp.lt.s32.totalorder %v257_v38, 2  ;;  %vm62_vm0 = vcmp.le.f32.partialorder %v61_v7, 0.7853982 }
  0xdb   :  { %v471_v60 = vsel %vm464_vm4, %v467_v14, %v470_v4  ;;  %v580_v63 = vmin.u32 %v127_v24, %v125_v17  ;;  %v148_v54 = vsel %vm63_vm15, %v147_v12, %v1076_v6  ;;  %vm153_vm4 = vweird.f32 %v738_v22  ;;  %v595_v4 = vld [vmem:[%s1126_s3] ss:$0 sm:$0xff] }
  0xdc   :  { %v472_v44 = vsel %vm462_vm5, nan, %v471_v60  ;;  %v150_v18 = vsel %vm62_vm0, 0, %v148_v54  ;;  %vm489_vm5 = vcmask 261120  }
  0xdd   :  { %603 = vmatpush3.msra.mxu0 %v472_v44  ;;  %v129_v57 = vclz %v580_v63  ;;  %v154_v53 = vand.u32 3, %v150_v18 }
  0xde   :  { %604 = vmatprep.subr.mxu0 %v680_v5  ;;  %v646_v55 = vpop.eup %645 }
  0xdf   :  { %v648_v33 = vpop.eup %647  ;;  %v366_v26 = vxor.u32 2147483648, %v646_v55  ;;  %v581_v9 = vadd.s32 4294967294, %v129_v57  ;;  %vm159_vm1 = vcmp.eq.s32.totalorder %v154_v53, 2  ;;  %vm156_vm2 = vcmp.eq.s32.totalorder %v154_v53, 0 }
  0xe0   :  { %v363_v27 = vxor.u32 2147483648, %v648_v33  ;;  %vm155_vm3 = vcmp.lt.s32.totalorder %v154_v53, 2 }
  0xe1   :  { %v367_v8 = vsel %vm365_vm6, %v366_v26, %v648_v33  ;;  %vm582_vm10 = vcmp.lt.s32.totalorder %v581_v9, 0 }
  0xe2   :  { %v364_v52 = vsel %vm362_vm7, %v646_v55, %v363_v27  ;;  %v132_v51 = vsel %vm582_vm10, 0, %v581_v9 }
  0xe3   :  { %v368_v30 = vsel %vm361_vm8, %v364_v52, %v367_v8  ;;  %v133_v16 = vsub.s32 32, %v132_v51  ;;  %v137_v41 = vsub.s32 4294967266, %v132_v51  ;;  %v134_v50 = vshll.u32 %v125_v17, %v132_v51 }
  0xe4   :  { %v369_v2 = vsel %vm359_vm9, nan, %v368_v30 }
  0xe5   :  { %605 = vmatpush3.msra.mxu0 %v369_v2  ;;  %v650_v48 = vpop.eup %649  ;;  %v135_v42 = vshrl.u32 %v117_v28, %v133_v16  ;;  %v138_v19 = vadd.s32 127, %v137_v41 }
  0xe6   :  { %606 = vmatprep.subr.mxu0 %v680_v5  ;;  %v652_v20 = vpop.eup %651  ;;  %v263_v46 = vxor.u32 2147483648, %v650_v48 }
  0xe7   :  { %v260_v21 = vxor.u32 2147483648, %v652_v20  ;;  %v136_v36 = vor.u32 %v135_v42, %v134_v50  ;;  %v139_v37 = vshll.u32 %v138_v19, 23 }
  0xe8   :  { %v264_v35 = vsel %vm262_vm11, %v263_v46, %v652_v20 }
  0xe9   :  { %v261_v43 = vsel %vm259_vm12, %v650_v48, %v260_v21  ;;  %v140_v13 = vor.u32 4788187, %v139_v37  ;;  %v143_v32 = vcvt.s32.f32 %v136_v36 }
  0xea   :  { %v265_v40 = vsel %vm258_vm13, %v261_v43, %v264_v35 }
  0xeb   :  { %v266_v34 = vsel %vm256_vm14, nan, %v265_v40  ;;  %v141_v25 = vand.u32 2147483647, %v140_v13 }
  0xec   :  { %607 = vmatpush3.msra.mxu0 %v266_v34 }
  0xed   :  { %608 = vmatprep.subr.mxu0 %v680_v5  ;;  %v144_v58 = vmul.f32 %v143_v32, %v141_v25 }
  0xef   :  { %v145_v31 = vxor.u32 2147483648, %v144_v58 }
  0xf1   :  { %v146_v49 = vsel %vm63_vm15, %v145_v31, %v144_v58 }
  0xf2   :  { %v149_v1 = vsel %vm62_vm0, %v738_v22, %v146_v49 }
  0xf3   :  { %653 = vcosq.f32 %v149_v1 }
  0xf4   :  { %655 = vsinq.f32 %v149_v1 }
 0x100   :  { %v654_v29 = vpop.eup %653 }
 0x101   :  { %v656_v5 = vpop.eup %655  ;;  %v160_v56 = vxor.u32 2147483648, %v654_v29 }
 0x102   :  { %v157_v59 = vxor.u32 2147483648, %v656_v5 }
 0x103   :  { %v161_v10 = vsel %vm159_vm1, %v160_v56, %v656_v5 }
 0x104   :  { %v158_v7 = vsel %vm156_vm2, %v654_v29, %v157_v59 }
 0x105   :  { %v162_v62 = vsel %vm155_vm3, %v158_v7, %v161_v10 }
 0x106   :  { %v163_v6 = vsel %vm153_vm4, nan, %v162_v62 }
 0x107   :  { %609 = vmatpush3.msra.mxu0 %v163_v6 }
 0x108   :  { %611 = vmatmul.mubr.msk.f32.vlgmr.msra.gmra.mxu0 %vm489_vm5, %v477_v45 }
 0x1c8   :  { %v559_v23 = vpop.f32.mrf.mxu0 }
 0x1c9   :  { %v560_v47 = vadd.f32 %v595_v4, %v559_v23 }
 0x1ca   :  { %v612_v14 = vpop.f32.mrf.mxu0 }
 0x1cb   :  { %563 = vst [vmem:[#allocation3] sm:$0xff] %v560_v47 }
 0x1cc   :  { %668 = shalt.err (!%p665_p4)
}
 0x1cd   :  { %573 = dma.vmem_to_hbm [thread:$0]  %s571_s28, 128, %s1127_s4, [#allocation4]  }
 0x1ce   :  { %677 = dma.done.wait [#allocation4], 128  }
 0x1cf   :  { %678 = vsyncadd [#allocation4], 4294967168 }
 0x1d0   :  { %577 = vsyncpa [#allocation4], 1 }

</bundles_post_ra>
